<compile_context>
chip_gen: v7x
topology: tpu7x:2x2x1
jax: 0.10.0
libtpu: 0.0.40
codegen_flags: <defaults>
</compile_context>

<pallas_src>
import functools

import jax
import jax.numpy as jnp
from jax.experimental import pallas as pl
from jax.experimental.pallas import tpu as pltpu

_LANES = 128
_SUBLANES = 8


def _round_up(n, m):
    return ((n + m - 1) // m) * m


def _mlp_fused_kernel(*refs, num_layers):
    """Fused (Linear -> ReLU -> Dropout)* -> Linear on one (tm, Kp) row tile.

    refs = (x_ref, w0_ref, b0_ref, ..., w{L-1}_ref, b{L-1}_ref, o_ref).
    Weights/biases are lane-dense padded and VMEM-resident across grid steps;
    intermediate activations never leave vregs/VMEM.
    """
    x_ref = refs[0]
    o_ref = refs[-1]
    wb_refs = refs[1:-1]

    h = x_ref[...]                                  # (tm, Kp) f32
    for li in range(num_layers):
        w = wb_refs[2 * li][...]                    # (Kp_l, Np_l) bf16
        b = wb_refs[2 * li + 1][...]                # (1, Np_l) f32, broadcasts
        # MXU matmul: bf16 operands, f32 accumulation.  Bias-add / ReLU in f32
        # on the VPU (correct on v5e which lacks a bf16 VPU path).
        h = jnp.dot(h.astype(jnp.bfloat16), w,
                    preferred_element_type=jnp.float32) + b
        if li < num_layers - 1:
            h = jnp.maximum(h, 0.0)
            # Dropout(rate=0) / eval mode == identity (no-op).
    o_ref[...] = h.astype(o_ref.dtype)


def pad_mlp_params(params):
    """One-time (init-time) padding + bf16 cast of the MLP parameters.

    Each w: (in, out) -> bf16 zero-padded to (round_up(in,128), round_up(out,128)).
    Each b: (out,) or (1, out) -> f32 zero-padded to (1, round_up(out,128)).
    Zero rows/cols contribute exactly 0 to the matmuls and relu(0)=0, so
    semantics are unchanged; the real output width is sliced out after the call.
    """
    padded = []
    for (w, b) in params:
        kp = _round_up(w.shape[0], _LANES)
        np_ = _round_up(w.shape[1], _LANES)
        wp = (jnp.zeros((kp, np_), jnp.bfloat16)
              .at[: w.shape[0], : w.shape[1]].set(w.astype(jnp.bfloat16)))
        bp = (jnp.zeros((1, np_), jnp.float32)
              .at[:, : b.shape[-1]].set(b.reshape(1, -1).astype(jnp.float32)))
        padded.append((wp, bp))
    return padded


@functools.partial(jax.jit, static_argnames=("out_dim",))
def mlp_forward(x, padded_params, *, out_dim):
    """Run the whole MLP as a single fused Pallas kernel.

    x: (M, K) float32; padded_params: output of pad_mlp_params.
    """
    M, K = x.shape
    num_layers = len(padded_params)
    Kp = padded_params[0][0].shape[0]
    Np = padded_params[-1][0].shape[1]

    # Row tiling: tm<=128 rows per grid step.  The "parallel" axis lets v7x's
    # two TensorCores split the batch; x/out tiles stream while weights stay
    # resident.  Small batches stay a single step (no wasted padding to 128).
    tm = min(128, _round_up(M, _SUBLANES))
    Mp = _round_up(M, tm)
    grid = (Mp // tm,)

    # Per-call padding is only on x (cheap); weights were pre-padded at init.
    xp = jnp.zeros((Mp, Kp), jnp.float32).at[:M, :K].set(x.astype(jnp.float32))

    wb_flat = []
    in_specs = [pl.BlockSpec((tm, Kp), lambda i: (i, 0))]   # streamed x tile
    for (wp, bp) in padded_params:
        wb_flat += [wp, bp]
        # Constant index_maps -> weights/biases resident across all M steps.
        in_specs.append(pl.BlockSpec(wp.shape, lambda i: (0, 0)))
        in_specs.append(pl.BlockSpec(bp.shape, lambda i: (0, 0)))
    out_spec = pl.BlockSpec((tm, Np), lambda i: (i, 0))     # streamed out tile

    # Cost estimate + VMEM budget (headroom, capped below v7x's 64 MiB).
    flops = 0
    bytes_accessed = xp.size * 4
    resident_bytes = 0
    widest = Kp
    for (wp, bp) in padded_params:
        flops += 2 * Mp * wp.shape[0] * wp.shape[1]
        bytes_accessed += wp.size * 2 + bp.size * 4
        resident_bytes += wp.size * 2 + bp.size * 4
        widest = max(widest, wp.shape[1])
    bytes_accessed += Mp * Np * 4
    tile_bytes = 2 * (tm * Kp * 4 + tm * Np * 4) + tm * widest * 4
    vmem_limit = int(min(max(2 * (resident_bytes + tile_bytes), 16 << 20),
                         48 << 20))

    out_p = pl.pallas_call(
        functools.partial(_mlp_fused_kernel, num_layers=num_layers),
        out_shape=jax.ShapeDtypeStruct((Mp, Np), jnp.float32),
        grid=grid,
        in_specs=in_specs,
        out_specs=out_spec,
        compiler_params=pltpu.CompilerParams(
            dimension_semantics=("parallel",),
            vmem_limit_bytes=vmem_limit),
        cost_estimate=pl.CostEstimate(
            flops=flops, transcendentals=0, bytes_accessed=bytes_accessed),
    )(xp, *wb_flat)

    # Slice the real output back out (cheap XLA slice, fused under jit).
    return out_p[:M, :out_dim]


def init_mlp_params(key, layer_dims):
    """Deterministic init; shapes match nn.Linear (stored transposed)."""
    params = []
    in_dim = layer_dims[0]
    for out_dim in layer_dims[1:]:
        key, kw, kb = jax.random.split(key, 3)
        scale = 1.0 / jnp.sqrt(jnp.float32(in_dim))
        w = jax.random.uniform(kw, (in_dim, out_dim), jnp.float32,
                               minval=-scale, maxval=scale)
        b = jax.random.uniform(kb, (1, out_dim), jnp.float32,
                               minval=-scale, maxval=scale)
        params.append((w, b))
        in_dim = out_dim
    return params


def mlp_reference(x, params):
    n = len(params)
    for li, (w, b) in enumerate(params):
        x = x @ w + b
        if li < n - 1:
            x = jnp.maximum(x, 0.0)
    return x


if __name__ == "__main__":
    # MLP(layer_dims=[32, 64, 48, 16]) -> two hidden Linear+ReLU, one output Linear.
    layer_dims = [32, 64, 48, 16]

    key = jax.random.PRNGKey(0)
    key, kp = jax.random.split(key)
    params = init_mlp_params(kp, layer_dims)
    padded_params = pad_mlp_params(params)          # one-time padding/cast

    # batch=8: single grid step; batch=300: multi-step grid + M padding path.
    for batch in (8, 300):
        key, kx = jax.random.split(key)
        x = jax.random.normal(kx, (batch, layer_dims[0]), jnp.float32)

        out = mlp_forward(x, padded_params, out_dim=layer_dims[-1])
        out = jax.block_until_ready(out)

        ref = mlp_reference(x, params)
        assert out.shape == (batch, layer_dims[-1])
        # bf16 MXU operands (f32 accumulation) -> looser tolerance vs exact f32.
        assert jnp.allclose(out, ref, atol=5e-2, rtol=5e-2), (
            "max abs err", float(jnp.max(jnp.abs(out - ref))))

    print("KERNEL_OK")
</pallas_src>

<mosaic_0001>
module attributes {stable_mosaic.version = 11 : i64} {
  func.func @_mlp_fused_kernel(%arg0: i32, %arg1: memref<8x128xf32, #tpu.memory_space<vmem>>, %arg2: memref<128x128xbf16, #tpu.memory_space<vmem>>, %arg3: memref<1x128xf32, #tpu.memory_space<vmem>>, %arg4: memref<128x128xbf16, #tpu.memory_space<vmem>>, %arg5: memref<1x128xf32, #tpu.memory_space<vmem>>, %arg6: memref<128x128xbf16, #tpu.memory_space<vmem>>, %arg7: memref<1x128xf32, #tpu.memory_space<vmem>>, %arg8: memref<8x128xf32, #tpu.memory_space<vmem>>) attributes {dimension_semantics = [#tpu.dimension_semantics<parallel>], iteration_bounds = array<i64: 1>, scalar_prefetch = 0 : i64, scratch_operands = 0 : i64, tpu.core_type = #tpu.core_type<tc>, window_params = [{transform_indices = @transform_0, window_bounds = array<i64: 8, 128>}, {pipeline_mode = #tpu.pipeline_mode<synchronous>, transform_indices = @transform_1, window_bounds = array<i64: 128, 128>}, {pipeline_mode = #tpu.pipeline_mode<synchronous>, transform_indices = @transform_2, window_bounds = array<i64: 1, 128>}, {pipeline_mode = #tpu.pipeline_mode<synchronous>, transform_indices = @transform_3, window_bounds = array<i64: 128, 128>}, {pipeline_mode = #tpu.pipeline_mode<synchronous>, transform_indices = @transform_4, window_bounds = array<i64: 1, 128>}, {pipeline_mode = #tpu.pipeline_mode<synchronous>, transform_indices = @transform_5, window_bounds = array<i64: 128, 128>}, {pipeline_mode = #tpu.pipeline_mode<synchronous>, transform_indices = @transform_6, window_bounds = array<i64: 1, 128>}, {transform_indices = @transform_7, window_bounds = array<i64: 8, 128>}]} {
    %c0 = arith.constant 0 : index
    %c0_0 = arith.constant 0 : index
    %0 = vector.load %arg1[%c0, %c0_0] : memref<8x128xf32, #tpu.memory_space<vmem>>, vector<8x128xf32>
    %c0_1 = arith.constant 0 : index
    %c0_2 = arith.constant 0 : index
    %1 = vector.load %arg2[%c0_1, %c0_2] : memref<128x128xbf16, #tpu.memory_space<vmem>>, vector<128x128xbf16>
    %c0_3 = arith.constant 0 : index
    %c0_4 = arith.constant 0 : index
    %2 = vector.load %arg3[%c0_3, %c0_4] : memref<1x128xf32, #tpu.memory_space<vmem>>, vector<1x128xf32>
    %3 = arith.truncf %0 : vector<8x128xf32> to vector<8x128xbf16>
    %cst = arith.constant dense<0.000000e+00> : vector<8x128xf32>
    %4 = tpu.matmul %3, %1, %cst {dimension_numbers = #tpu.dot_dimension_numbers<[1], [0], [0], [1], [0, 0, 1, 1], [], []>} : vector<8x128xbf16>, vector<128x128xbf16>, vector<8x128xf32> -> vector<8x128xf32>
    %5 = vector.broadcast %2 : vector<1x128xf32> to vector<8x128xf32>
    %6 = arith.addf %4, %5 : vector<8x128xf32>
    %cst_5 = arith.constant 0.000000e+00 : f32
    %7 = vector.broadcast %cst_5 : f32 to vector<8x128xf32>
    %8 = arith.maximumf %6, %7 : vector<8x128xf32>
    %c0_6 = arith.constant 0 : index
    %c0_7 = arith.constant 0 : index
    %9 = vector.load %arg4[%c0_6, %c0_7] : memref<128x128xbf16, #tpu.memory_space<vmem>>, vector<128x128xbf16>
    %c0_8 = arith.constant 0 : index
    %c0_9 = arith.constant 0 : index
    %10 = vector.load %arg5[%c0_8, %c0_9] : memref<1x128xf32, #tpu.memory_space<vmem>>, vector<1x128xf32>
    %11 = arith.truncf %8 : vector<8x128xf32> to vector<8x128xbf16>
    %cst_10 = arith.constant dense<0.000000e+00> : vector<8x128xf32>
    %12 = tpu.matmul %11, %9, %cst_10 {dimension_numbers = #tpu.dot_dimension_numbers<[1], [0], [0], [1], [0, 0, 1, 1], [], []>} : vector<8x128xbf16>, vector<128x128xbf16>, vector<8x128xf32> -> vector<8x128xf32>
    %13 = vector.broadcast %10 : vector<1x128xf32> to vector<8x128xf32>
    %14 = arith.addf %12, %13 : vector<8x128xf32>
    %cst_11 = arith.constant 0.000000e+00 : f32
    %15 = vector.broadcast %cst_11 : f32 to vector<8x128xf32>
    %16 = arith.maximumf %14, %15 : vector<8x128xf32>
    %c0_12 = arith.constant 0 : index
    %c0_13 = arith.constant 0 : index
    %17 = vector.load %arg6[%c0_12, %c0_13] : memref<128x128xbf16, #tpu.memory_space<vmem>>, vector<128x128xbf16>
    %c0_14 = arith.constant 0 : index
    %c0_15 = arith.constant 0 : index
    %18 = vector.load %arg7[%c0_14, %c0_15] : memref<1x128xf32, #tpu.memory_space<vmem>>, vector<1x128xf32>
    %19 = arith.truncf %16 : vector<8x128xf32> to vector<8x128xbf16>
    %cst_16 = arith.constant dense<0.000000e+00> : vector<8x128xf32>
    %20 = tpu.matmul %19, %17, %cst_16 {dimension_numbers = #tpu.dot_dimension_numbers<[1], [0], [0], [1], [0, 0, 1, 1], [], []>} : vector<8x128xbf16>, vector<128x128xbf16>, vector<8x128xf32> -> vector<8x128xf32>
    %21 = vector.broadcast %18 : vector<1x128xf32> to vector<8x128xf32>
    %22 = arith.addf %20, %21 : vector<8x128xf32>
    %c0_17 = arith.constant 0 : index
    %c0_18 = arith.constant 0 : index
    %23 = vector.load %arg8[%c0_17, %c0_18] : memref<8x128xf32, #tpu.memory_space<vmem>>, vector<8x128xf32>
    tpu.vector_store %arg8[%c0_17, %c0_18], %22 {strides = array<i32>} : memref<8x128xf32, #tpu.memory_space<vmem>>, vector<8x128xf32>,
    return
  }
  func.func @transform_0(%arg0: i32) -> (i32, i32) {
    %c0_i32 = arith.constant 0 : i32
    %c0_i32_0 = arith.constant 0 : i32
    return %arg0, %c0_i32 : i32, i32
  }
  func.func @transform_1(%arg0: i32) -> (i32, i32) {
    %c0_i32 = arith.constant 0 : i32
    %c0_i32_0 = arith.constant 0 : i32
    %c0_i32_1 = arith.constant 0 : i32
    return %c0_i32, %c0_i32_0 : i32, i32
  }
  func.func @transform_2(%arg0: i32) -> (i32, i32) {
    %c0_i32 = arith.constant 0 : i32
    %c0_i32_0 = arith.constant 0 : i32
    %c0_i32_1 = arith.constant 0 : i32
    return %c0_i32, %c0_i32_0 : i32, i32
  }
  func.func @transform_3(%arg0: i32) -> (i32, i32) {
    %c0_i32 = arith.constant 0 : i32
    %c0_i32_0 = arith.constant 0 : i32
    %c0_i32_1 = arith.constant 0 : i32
    return %c0_i32, %c0_i32_0 : i32, i32
  }
  func.func @transform_4(%arg0: i32) -> (i32, i32) {
    %c0_i32 = arith.constant 0 : i32
    %c0_i32_0 = arith.constant 0 : i32
    %c0_i32_1 = arith.constant 0 : i32
    return %c0_i32, %c0_i32_0 : i32, i32
  }
  func.func @transform_5(%arg0: i32) -> (i32, i32) {
    %c0_i32 = arith.constant 0 : i32
    %c0_i32_0 = arith.constant 0 : i32
    %c0_i32_1 = arith.constant 0 : i32
    return %c0_i32, %c0_i32_0 : i32, i32
  }
  func.func @transform_6(%arg0: i32) -> (i32, i32) {
    %c0_i32 = arith.constant 0 : i32
    %c0_i32_0 = arith.constant 0 : i32
    %c0_i32_1 = arith.constant 0 : i32
    return %c0_i32, %c0_i32_0 : i32, i32
  }
  func.func @transform_7(%arg0: i32) -> (i32, i32) {
    %c0_i32 = arith.constant 0 : i32
    %c0_i32_0 = arith.constant 0 : i32
    return %arg0, %c0_i32 : i32, i32
  }
}

</mosaic_0001>

<bundles_post_ra>
// kernel: mlp_forward.1
= control target key start
LH: loop header
LB: loop body
LE: loop exit
PB: predicated region body
PF: predicated region fallthrough
CT: control target
= control target key end

     0   :  { %12 = vsyncpa [#allocation3], 0  ;;  %s819_s0 = inlined_call_operand.vmem [shape: f32[8,128], index: 0, kind: input, shape index: {}]   ;;  %s820_s1 = inlined_call_operand.hbm [shape: bf16[128,128], index: 1, kind: input, shape index: {}]   ;;  %s821_s2 = inlined_call_operand.vmem [shape: f32[1,128], index: 2, kind: input, shape index: {}]   ;;  %s822_s3 = inlined_call_operand.hbm [shape: bf16[128,128], index: 3, kind: input, shape index: {}]   ;;  %s823_s4 = inlined_call_operand.vmem [shape: f32[1,128], index: 4, kind: input, shape index: {}]   ;;  %s824_s5 = inlined_call_operand.hbm [shape: bf16[128,128], index: 5, kind: input, shape index: {}]   ;;  %s825_s6 = inlined_call_operand.vmem [shape: f32[1,128], index: 6, kind: input, shape index: {}]   ;;  %s826_s7 = inlined_call_operand.hbm [shape: f32[8,128], index: 7, kind: output, shape index: {}]  }
   0x1   :  { %13 = vsyncpa [#allocation6], 0 }
   0x2   :  { %14 = vsyncpa [#allocation4], 0  ;;  %s665_s24 = smov [#allocation5]   ;;  %s666_s26 = smov [#allocation2]  }
   0x3   :  { %s36_s25 = sshll.u32 %s665_s24, 4  ;;  %s22_s27 = sshll.u32 %s666_s26, 4  ;;  %s37_s25 = int_to_ptr.vmem [resolvable:$true] %s36_s25  ;;  %s713_s27 = int_to_ptr.vmem [resolvable:$true] %s22_s27 }
   0x4   :  { %s571_s30 = scalar_lea.hbm %s822_s3, 1024 }
   0x5   :  { %p572_p0 = scmp.ne.s32.totalorder %s822_s3, %s571_s30  ;;  %p575_p1 = scmp.lt.u32.totalorder %s571_s30, %s822_s3 }
   0x7   :  { %p577_p2 = pnand %p575_p1, %p572_p0 }
   0x9   :  { %580 = shalt.err (!%p577_p2)
}
   0xa   :  { %s581_s12 = scalar_lea.vmem %s37_s25, 1024  ;;  %p586_p4 = scmp.lt.s32.totalorder %s37_s25, %s37_s25 }
   0xb   :  { %p582_p3 = scmp.ne.s32.totalorder %s37_s25, %s581_s12  ;;  %p587_p5 = scmp.lt.s32.totalorder %s581_s12, %s581_s12 }
   0xd   :  { %p588_p6 = por %p587_p5, %p586_p4 }
   0xf   :  { %p589_p7 = pnand %p588_p6, %p582_p3 }
  0x11   :  { %592 = shalt.err (!%p589_p7)
}
  0x12   :  { %s667_s13 = smov 64   ;;  %s668_s14 = smov 4  }
  0x13   :  { %42 = dma.hbm_to_vmem [thread:$0]  %s822_s3, 1024, %s37_s25, [#allocation6], %s667_s13, %s667_s13, %s668_s14  }
  0x14   :  { %s593_s19 = scalar_lea.hbm %s820_s1, 1024 }
  0x15   :  { %p594_p8 = scmp.ne.s32.totalorder %s820_s1, %s593_s19  ;;  %p597_p9 = scmp.lt.u32.totalorder %s593_s19, %s820_s1 }
  0x17   :  { %p599_p10 = pnand %p597_p9, %p594_p8 }
  0x19   :  { %602 = shalt.err (!%p599_p10)
}
  0x1a   :  { %s603_s24 = scalar_lea.vmem %s713_s27, 1024  ;;  %p608_p12 = scmp.lt.s32.totalorder %s713_s27, %s713_s27 }
  0x1b   :  { %p604_p11 = scmp.ne.s32.totalorder %s713_s27, %s603_s24  ;;  %p609_p13 = scmp.lt.s32.totalorder %s603_s24, %s603_s24 }
  0x1d   :  { %p610_p0 = por %p609_p13, %p608_p12 }
  0x1f   :  { %p611_p1 = pnand %p610_p0, %p604_p11 }
  0x21   :  { %614 = shalt.err (!%p611_p1)
}
  0x22   :  { %28 = dma.hbm_to_vmem [thread:$0]  %s820_s1, 1024, %s713_s27, [#allocation3], %s667_s13, %s667_s13, %s668_s14  }
  0x23   :  { %s669_s26 = smov [#allocation7]   ;;  %s615_s8 = scalar_lea.hbm %s824_s5, 1024 }
  0x24   :  { %s50_s28 = sshll.u32 %s669_s26, 4  ;;  %p616_p2 = scmp.ne.s32.totalorder %s824_s5, %s615_s8  ;;  %s51_s28 = int_to_ptr.vmem [resolvable:$true] %s50_s28 }
  0x25   :  { %p619_p3 = scmp.lt.u32.totalorder %s615_s8, %s824_s5 }
  0x27   :  { %p621_p4 = pnand %p619_p3, %p616_p2 }
  0x29   :  { %624 = shalt.err (!%p621_p4)
}
  0x2a   :  { %s625_s15 = scalar_lea.vmem %s51_s28, 1024  ;;  %p630_p6 = scmp.lt.s32.totalorder %s51_s28, %s51_s28 }
  0x2b   :  { %p626_p5 = scmp.ne.s32.totalorder %s51_s28, %s625_s15  ;;  %p631_p7 = scmp.lt.s32.totalorder %s625_s15, %s625_s15 }
  0x2d   :  { %p632_p8 = por %p631_p7, %p630_p6 }
  0x2f   :  { %p633_p9 = pnand %p632_p8, %p626_p5 }
  0x31   :  { %636 = shalt.err (!%p633_p9)
}
  0x32   :  { %56 = dma.hbm_to_vmem [thread:$0]  %s824_s5, 1024, %s51_s28, [#allocation6], %s667_s13, %s667_s13, %s668_s14  }
  0x33   :  { %659 = dma.done.wait [#allocation3], 1024  }
  0x34   :  { %660 = vsyncadd [#allocation3], 4294966272 }
  0x35   :  { %661 = dma.done.wait [#allocation6], 2048  }
  0x36   :  { %662 = vsyncadd [#allocation6], 4294965248  ;;  %v670_v0 = vmov 0.0   ;;  %vm671_vm0 = vmmov 0   ;;  %v547_v1 = vld [vmem:[#allocation2] sm:$0xff]   ;;  %v548_v2 = vld [vmem:[#allocation2 + $0x8] sm:$0xff]  }
  0x37   :  { %479 = vmatprep.subr.bf16.mxu0 %v670_v0  ;;  %495 = vmatprep.mubr.msk.bf16.mxu0 %vm671_vm0, %v670_v0  ;;  %v549_v3 = vld [vmem:[#allocation2 + $0x10] sm:$0xff]   ;;  %v555_v4 = vld [vmem:[#allocation5] sm:$0xff]   ;;  %v550_v5 = vld [vmem:[#allocation2 + $0x18] sm:$0xff]   ;;  %s672_s19 = smov [#allocation8]  }
  0x38   :  { %499 = vmatprep.subr.bf16.mxu1 %v670_v0  ;;  %515 = vmatprep.mubr.msk.bf16.mxu1 %vm671_vm0, %v670_v0  ;;  %v556_v6 = vld [vmem:[#allocation5 + $0x8] sm:$0xff]   ;;  %v551_v7 = vld [vmem:[#allocation2 + $0x20] sm:$0xff]   ;;  %v557_v8 = vld [vmem:[#allocation5 + $0x10] sm:$0xff]   ;;  %s415_s20 = sshll.u32 %s672_s19, 4  ;;  %s416_s20 = int_to_ptr.vmem [resolvable:$true] %s415_s20 }
  0x39   :  { %480 = vmatpush3.bf16.msra.mxu0 %v547_v1  ;;  %500 = vmatpush3.bf16.msra.mxu1 %v555_v4  ;;  %v552_v9 = vld [vmem:[#allocation2 + $0x28] sm:$0xff]   ;;  %v558_v10 = vld [vmem:[#allocation5 + $0x18] sm:$0xff]   ;;  %v553_v11 = vld [vmem:[#allocation2 + $0x30] sm:$0xff]   ;;  %p642_p11 = scmp.lt.s32.totalorder %s416_s20, %s416_s20 }
  0x3a   :  { %481 = vmatprep.subr.bf16.mxu0 %v670_v0  ;;  %501 = vmatprep.subr.bf16.mxu1 %v670_v0  ;;  %v559_v12 = vld [vmem:[#allocation5 + $0x20] sm:$0xff]   ;;  %v554_v13 = vld [vmem:[#allocation2 + $0x38] sm:$0xff]   ;;  %v560_v15 = vld [vmem:[#allocation5 + $0x28] sm:$0xff]  }
  0x3b   :  { %v69_v14 = vld [vmem:[%s819_s0] sm:$0xff]  ;;  %v561_v17 = vld [vmem:[#allocation5 + $0x30] sm:$0xff]   ;;  %v562_v18 = vld [vmem:[#allocation5 + $0x38] sm:$0xff]  }
  0x3c   :  { %v87_v16 = vpack.c.bf16 %v69_v14, %v69_v14  ;;  %v563_v19 = vld [vmem:[#allocation7] sm:$0xff]   ;;  %v564_v20 = vld [vmem:[#allocation7 + $0x8] sm:$0xff]   ;;  %v565_v21 = vld [vmem:[#allocation7 + $0x10] sm:$0xff]  }
  0x3d   :  { %482 = vmatpush3.bf16.msra.mxu0 %v548_v2  ;;  %502 = vmatpush3.bf16.msra.mxu1 %v556_v6  ;;  %v566_v22 = vld [vmem:[#allocation7 + $0x18] sm:$0xff]   ;;  %v567_v23 = vld [vmem:[#allocation7 + $0x20] sm:$0xff]   ;;  %v568_v24 = vld [vmem:[#allocation7 + $0x28] sm:$0xff]  }
  0x3e   :  { %483 = vmatprep.subr.bf16.mxu0 %v670_v0  ;;  %503 = vmatprep.subr.bf16.mxu1 %v670_v0  ;;  %v425_v25 = vld [vmem:[%s821_s2] ss:$0 sm:$0xff]  ;;  %v569_v33 = vld [vmem:[#allocation7 + $0x30] sm:$0xff]   ;;  %v570_v34 = vld [vmem:[#allocation7 + $0x38] sm:$0xff]  }
  0x3f   :  { %v434_v35 = vld [vmem:[%s823_s4] ss:$0 sm:$0xff]  ;;  %s637_s4 = scalar_lea.vmem %s416_s20, 128 }
  0x40   :  { %v443_v43 = vld [vmem:[%s825_s6] ss:$0 sm:$0xff]  ;;  %p638_p10 = scmp.ne.s32.totalorder %s416_s20, %s637_s4  ;;  %p643_p12 = scmp.lt.s32.totalorder %s637_s4, %s637_s4 }
  0x41   :  { %484 = vmatpush3.bf16.msra.mxu0 %v549_v3  ;;  %504 = vmatpush3.bf16.msra.mxu1 %v557_v8 }
  0x42   :  { %485 = vmatprep.subr.bf16.mxu0 %v670_v0  ;;  %505 = vmatprep.subr.bf16.mxu1 %v670_v0  ;;  %p644_p13 = por %p643_p12, %p642_p11 }
  0x44   :  { %p645_p0 = pnand %p644_p13, %p638_p10 }
  0x45   :  { %486 = vmatpush3.bf16.msra.mxu0 %v550_v5  ;;  %506 = vmatpush3.bf16.msra.mxu1 %v558_v10 }
  0x46   :  { %487 = vmatprep.subr.bf16.mxu0 %v670_v0  ;;  %507 = vmatprep.subr.bf16.mxu1 %v670_v0 }
  0x49   :  { %488 = vmatpush3.bf16.msra.mxu0 %v551_v7  ;;  %508 = vmatpush3.bf16.msra.mxu1 %v559_v12 }
  0x4a   :  { %489 = vmatprep.subr.bf16.mxu0 %v670_v0  ;;  %509 = vmatprep.subr.bf16.mxu1 %v670_v0 }
  0x4d   :  { %490 = vmatpush3.bf16.msra.mxu0 %v552_v9  ;;  %510 = vmatpush3.bf16.msra.mxu1 %v560_v15 }
  0x4e   :  { %491 = vmatprep.subr.bf16.mxu0 %v670_v0  ;;  %511 = vmatprep.subr.bf16.mxu1 %v670_v0 }
  0x51   :  { %492 = vmatpush3.bf16.msra.mxu0 %v553_v11  ;;  %512 = vmatpush3.bf16.msra.mxu1 %v561_v17 }
  0x52   :  { %493 = vmatprep.subr.bf16.mxu0 %v670_v0  ;;  %513 = vmatprep.subr.bf16.mxu1 %v670_v0 }
  0x55   :  { %494 = vmatpush3.bf16.msra.mxu0 %v554_v13  ;;  %514 = vmatpush3.bf16.msra.mxu1 %v562_v18 }
  0x56   :  { %519 = vmatprep.subr.bf16.mxu0 %v670_v0 }
  0x58   :  { %496 = vmatmul.mubr.bf16.vlgmr.msra.gmra.mrb[0].mxu0 %v87_v16 }
  0x59   :  { %535 = vmatprep.mubr.msk.bf16.mxu0 %vm671_vm0, %v670_v0  ;;  %520 = vmatpush3.bf16.msra.mxu0 %v563_v19 }
  0x5a   :  { %521 = vmatprep.subr.bf16.mxu0 %v670_v0 }
  0x5d   :  { %522 = vmatpush3.bf16.msra.mxu0 %v564_v20 }
  0x5e   :  { %523 = vmatprep.subr.bf16.mxu0 %v670_v0 }
  0x61   :  { %524 = vmatpush3.bf16.msra.mxu0 %v565_v21 }
  0x62   :  { %525 = vmatprep.subr.bf16.mxu0 %v670_v0 }
  0x65   :  { %526 = vmatpush3.bf16.msra.mxu0 %v566_v22 }
  0x66   :  { %527 = vmatprep.subr.bf16.mxu0 %v670_v0 }
  0x69   :  { %528 = vmatpush3.bf16.msra.mxu0 %v567_v23 }
  0x6a   :  { %529 = vmatprep.subr.bf16.mxu0 %v670_v0 }
  0x6d   :  { %530 = vmatpush3.bf16.msra.mxu0 %v568_v24 }
  0x6e   :  { %531 = vmatprep.subr.bf16.mxu0 %v670_v0 }
  0x71   :  { %532 = vmatpush3.bf16.msra.mxu0 %v569_v33 }
  0x72   :  { %533 = vmatprep.subr.bf16.mxu0 %v670_v0 }
  0x75   :  { %534 = vmatpush3.bf16.msra.mxu0 %v570_v34 }
 0x12b   :  { %v176_v26 = vpop.f32.mrb[0].mxu0 }
 0x12c   :  { %v177_v27 = vadd.f32 %v425_v25, %v176_v26  ;;  %v497_v28 = vpop.f32.mrb[1].mxu0 }
 0x12d   :  { %v179_v29 = vpop.f32.mrb[2].mxu0 }
 0x12e   :  { %v182_v30 = vmax.f32 %v177_v27, 0.0  ;;  %v498_v31 = vpop.f32.mrb[3].mxu0 }
 0x130   :  { %v200_v32 = vpack.c.bf16 %v182_v30, %v182_v30 }
 0x132   :  { %516 = vmatmul.mubr.bf16.vlgmr.msra.gmra.mrb[0].mxu1 %v200_v32 }
 0x205   :  { %v289_v36 = vpop.f32.mrb[0].mxu1 }
 0x206   :  { %v290_v37 = vadd.f32 %v434_v35, %v289_v36  ;;  %v517_v38 = vpop.f32.mrb[1].mxu1 }
 0x207   :  { %v292_v39 = vpop.f32.mrb[2].mxu1 }
 0x208   :  { %v295_v40 = vmax.f32 %v290_v37, 0.0  ;;  %v518_v41 = vpop.f32.mrb[3].mxu1 }
 0x20a   :  { %v313_v42 = vpack.c.bf16 %v295_v40, %v295_v40 }
 0x20c   :  { %536 = vmatmul.mubr.bf16.vlgmr.msra.gmra.mrb[4].mxu0 %v313_v42 }
 0x2df   :  { %v402_v44 = vpop.f32.mrb[4].mxu0 }
 0x2e0   :  { %v403_v45 = vadd.f32 %v443_v43, %v402_v44  ;;  %v537_v46 = vpop.f32.mrb[5].mxu0 }
 0x2e1   :  { %v405_v47 = vpop.f32.mrb[6].mxu0 }
 0x2e2   :  { %408 = vst [vmem:[#allocation8] sm:$0xff] %v403_v45  ;;  %v538_v48 = vpop.f32.mrb[7].mxu0 }
 0x2e3   :  { %648 = shalt.err (!%p645_p0)
}
 0x2e4   :  { %s649_s6 = scalar_lea.hbm %s826_s7, 128 }
 0x2e5   :  { %p650_p1 = scmp.ne.s32.totalorder %s826_s7, %s649_s6  ;;  %p653_p2 = scmp.lt.u32.totalorder %s649_s6, %s826_s7 }
 0x2e7   :  { %p655_p3 = pnand %p653_p2, %p650_p1 }
 0x2e9   :  { %658 = shalt.err (!%p655_p3)
}
 0x2ea   :  { %418 = dma.vmem_to_hbm [thread:$0]  %s416_s20, 128, %s826_s7, [#allocation4]  }
 0x2eb   :  { %663 = dma.done.wait [#allocation4], 128  }
 0x2ec   :  { %664 = vsyncadd [#allocation4], 4294967168 }
 0x2ed   :  { %422 = vsyncpa [#allocation3], 1 }
 0x2ee   :  { %423 = vsyncpa [#allocation6], 1 }
 0x2ef   :  { %424 = vsyncpa [#allocation4], 1 }

</bundles_post_ra>
